<compile_context>
chip_gen: v6e
topology: v6e:2x2x1
jax: 0.10.0
libtpu: 0.0.40
codegen_flags: <defaults>
</compile_context>

<pallas_src>
import functools

import jax
import jax.numpy as jnp
from jax.experimental import pallas as pl
from jax.experimental.pallas import tpu as pltpu


def _dropout_kernel(x_ref, bits_ref, o_ref, *, threshold):
    # Keep element iff its random uint32 is below the integer threshold
    # (equivalent to torch.rand(...) < p, keep-probability ~= p).
    x = x_ref[...]
    keep = bits_ref[...] < jnp.uint32(threshold)
    o_ref[...] = jnp.where(keep, x, jnp.zeros_like(x))


def _choose_tile(dim, max_tile, align):
    """Largest legal tile: full dim if it fits, else an `align`-multiple <= max_tile."""
    if dim <= max_tile:
        return dim                      # block == full array dim is always legal
    return max(align, (max_tile // align) * align)


def dropout_layer(x, *, p=0.5, seed=0, key=None, training=True):
    """Forward pass of DropoutLayer. x: (batch, num_features)."""
    if not training:
        return x
    assert x.ndim == 2, "DropoutLayer expects a 2-D (batch, num_features) input"
    batch, num_features = x.shape

    if key is None:
        key = jax.random.PRNGKey(seed)
    bits = jax.random.bits(key, (batch, num_features), dtype=jnp.uint32)

    # Integer threshold so that P(bits < threshold) ~= p, clamped to uint32 range.
    # (p is baked in -> distinct p values recompile; pass via SMEM if p varies often.)
    threshold = min(max(int(p * (1 << 32)), 0), (1 << 32) - 1)

    # Tile sizes: sublane tile multiple of 8 (also covers bf16/int8 packing since 512
    # is a multiple of 16/32), lane tile multiple of 128 for unmasked stores.
    tb = _choose_tile(batch, 512, 8)
    tf = _choose_tile(num_features, 1024, 128)
    grid = (pl.cdiv(batch, tb), pl.cdiv(num_features, tf))

    kernel = functools.partial(_dropout_kernel, threshold=threshold)
    return pl.pallas_call(
        kernel,
        out_shape=jax.ShapeDtypeStruct(x.shape, x.dtype),
        grid=grid,
        in_specs=[
            pl.BlockSpec((tb, tf), lambda i, j: (i, j)),   # x
            pl.BlockSpec((tb, tf), lambda i, j: (i, j)),   # random bits
        ],
        out_specs=pl.BlockSpec((tb, tf), lambda i, j: (i, j)),
        compiler_params=pltpu.CompilerParams(
            dimension_semantics=("parallel", "parallel")),
    )(x, bits)


if __name__ == "__main__":
    key = jax.random.PRNGKey(0)
    xkey, mkey = jax.random.split(key)

    batch, num_features = 8, 256
    x = jax.random.normal(xkey, (batch, num_features), dtype=jnp.float32)

    out = dropout_layer(x, p=0.5, key=mkey, training=True)
    out = jax.block_until_ready(out)

    # Sanity: every output element is either 0 or exactly the input element.
    is_zero = out == 0.0
    is_pass = out == x
    assert bool(jnp.all(is_zero | is_pass))
    # Keep fraction should be roughly p.
    keep_frac = float(jnp.mean(is_pass.astype(jnp.float32)))
    assert 0.3 < keep_frac < 0.7, keep_frac

    # Eval mode is identity.
    out_eval = jax.block_until_ready(dropout_layer(x, p=0.5, training=False))
    assert bool(jnp.all(out_eval == x))

    print("KERNEL_OK")
</pallas_src>

<mosaic_0001>
module attributes {stable_mosaic.version = 11 : i64} {
  func.func @_dropout_kernel(%arg0: i32, %arg1: i32, %arg2: memref<8x256xf32, #tpu.memory_space<vmem>>, %arg3: memref<8x256xi32, #tpu.memory_space<vmem>>, %arg4: memref<8x256xf32, #tpu.memory_space<vmem>>) attributes {dimension_semantics = [#tpu.dimension_semantics<parallel>, #tpu.dimension_semantics<parallel>], iteration_bounds = array<i64: 1, 1>, scalar_prefetch = 0 : i64, scratch_operands = 0 : i64, tpu.core_type = #tpu.core_type<tc>, window_params = [{transform_indices = @transform_0, window_bounds = array<i64: 8, 256>}, {transform_indices = @transform_1, window_bounds = array<i64: 8, 256>}, {transform_indices = @transform_2, window_bounds = array<i64: 8, 256>}]} {
    %c0 = arith.constant 0 : index
    %c0_0 = arith.constant 0 : index
    %0 = vector.load %arg2[%c0, %c0_0] : memref<8x256xf32, #tpu.memory_space<vmem>>, vector<8x256xf32>
    %c0_1 = arith.constant 0 : index
    %c0_2 = arith.constant 0 : index
    %1 = vector.load %arg3[%c0_1, %c0_2] : memref<8x256xi32, #tpu.memory_space<vmem>>, vector<8x256xi32>
    %c-2147483648_i32 = arith.constant -2147483648 : i32
    %2 = vector.broadcast %c-2147483648_i32 : i32 to vector<8x256xi32>
    %3 = arith.cmpi ult, %1, %2 : vector<8x256xi32>
    %cst = arith.constant 0.000000e+00 : f32
    %4 = vector.broadcast %cst : f32 to vector<8x256xf32>
    %5 = arith.select %3, %0, %4 : vector<8x256xi1>, vector<8x256xf32>
    %c0_3 = arith.constant 0 : index
    %c0_4 = arith.constant 0 : index
    %6 = vector.load %arg4[%c0_3, %c0_4] : memref<8x256xf32, #tpu.memory_space<vmem>>, vector<8x256xf32>
    tpu.vector_store %arg4[%c0_3, %c0_4], %5 {strides = array<i32>} : memref<8x256xf32, #tpu.memory_space<vmem>>, vector<8x256xf32>,
    return
  }
  func.func @transform_0(%arg0: i32, %arg1: i32) -> (i32, i32) {
    %c0_i32 = arith.constant 0 : i32
    return %arg0, %arg1 : i32, i32
  }
  func.func @transform_1(%arg0: i32, %arg1: i32) -> (i32, i32) {
    %c0_i32 = arith.constant 0 : i32
    return %arg0, %arg1 : i32, i32
  }
  func.func @transform_2(%arg0: i32, %arg1: i32) -> (i32, i32) {
    %c0_i32 = arith.constant 0 : i32
    return %arg0, %arg1 : i32, i32
  }
}

</mosaic_0001>

<bundles_post_ra>
// kernel: tpu_custom_call.1
= control target key start
LH: loop header
LB: loop body
LE: loop exit
PB: predicated region body
PF: predicated region fallthrough
CT: control target
= control target key end

     0   :  { %7 = vsyncpa [#allocation3], 0  ;;  %s158_s0 = inlined_call_operand.hbm [shape: f32[8,256], index: 0, kind: input, shape index: {}]   ;;  %s159_s1 = inlined_call_operand.hbm [shape: u32[8,256], index: 1, kind: input, shape index: {}]   ;;  %s160_s2 = inlined_call_operand.hbm [shape: f32[8,256], index: 2, kind: output, shape index: {}]  }
   0x1   :  { %8 = vsyncpa [#allocation6], 0 }
   0x2   :  { %9 = vsyncpa [#allocation4], 0  ;;  %s131_s9 = smov [#allocation2]   ;;  %s132_s11 = smov [#allocation5]  }
   0x3   :  { %s16_s10 = sshll.u32 %s131_s9, 4  ;;  %s26_s12 = sshll.u32 %s132_s11, 4  ;;  %s17_s10 = int_to_ptr.vmem [resolvable:$true] %s16_s10  ;;  %s27_s12 = int_to_ptr.vmem [resolvable:$true] %s26_s12 }
   0x4   :  { %s73_s13 = scalar_lea.vmem %s17_s10, 256  ;;  %p78_p1 = scmp.lt.s32.totalorder %s17_s10, %s17_s10 }
   0x5   :  { %p74_p0 = scmp.ne.s32.totalorder %s17_s10, %s73_s13  ;;  %p79_p2 = scmp.lt.s32.totalorder %s73_s13, %s73_s13 }
   0x7   :  { %p80_p3 = por %p79_p2, %p78_p1 }
   0x9   :  { %p81_p4 = pnand %p80_p3, %p74_p0 }
   0xb   :  { %84 = shalt.err (!%p81_p4)
}
   0xc   :  { %19 = dma.hbm_to_vmem [thread:$0]  %s158_s0, 256, %s17_s10, [#allocation3]  }
   0xd   :  { %s93_s16 = scalar_lea.vmem %s27_s12, 256  ;;  %p98_p6 = scmp.lt.s32.totalorder %s27_s12, %s27_s12 }
   0xe   :  { %p94_p5 = scmp.ne.s32.totalorder %s27_s12, %s93_s16  ;;  %p99_p7 = scmp.lt.s32.totalorder %s93_s16, %s93_s16 }
  0x10   :  { %p100_p8 = por %p99_p7, %p98_p6 }
  0x12   :  { %p101_p9 = pnand %p100_p8, %p94_p5 }
  0x14   :  { %104 = shalt.err (!%p101_p9)
}
  0x15   :  { %29 = dma.hbm_to_vmem [thread:$0]  %s159_s1, 256, %s27_s12, [#allocation6]  }
  0x16   :  { %125 = dma.done.wait [#allocation3], 256  }
  0x17   :  { %126 = vsyncadd [#allocation3], 4294967040 }
  0x18   :  { %127 = dma.done.wait [#allocation6], 256  }
  0x19   :  { %128 = vsyncadd [#allocation6], 4294967040  ;;  %s133_s19 = smov [#allocation7]   ;;  %v36_v0 = vld [vmem:[#allocation2] sm:$0xff]  ;;  %v38_v1 = vld [vmem:[#allocation5] sm:$0xff] }
  0x1a   :  { %s52_s20 = sshll.u32 %s133_s19, 4  ;;  %v37_v2 = vld [vmem:[#allocation2 + $0x8] sm:$0xff]  ;;  %vm40_vm0 = vcmp.lt.u32.totalorder %v38_v1, 2147483648  ;;  %v39_v3 = vld [vmem:[#allocation5 + $0x8] sm:$0xff]  ;;  %s53_s20 = int_to_ptr.vmem [resolvable:$true] %s52_s20 }
  0x1b   :  { %v42_v4 = vsel %vm40_vm0, %v36_v0, 0.0  ;;  %vm41_vm1 = vcmp.lt.u32.totalorder %v39_v3, 2147483648  ;;  %s105_s0 = scalar_lea.vmem %s53_s20, 256  ;;  %p110_p11 = scmp.lt.s32.totalorder %s53_s20, %s53_s20 }
  0x1c   :  { %44 = vst [vmem:[#allocation7] sm:$0xff] %v42_v4  ;;  %v43_v5 = vsel %vm41_vm1, %v37_v2, 0.0  ;;  %p106_p10 = scmp.ne.s32.totalorder %s53_s20, %s105_s0  ;;  %p111_p12 = scmp.lt.s32.totalorder %s105_s0, %s105_s0 }
  0x1d   :  { %45 = vst [vmem:[#allocation7 + $0x8] sm:$0xff] %v43_v5 }
  0x1e   :  { %p112_p13 = por %p111_p12, %p110_p11 }
  0x20   :  { %p113_p0 = pnand %p112_p13, %p106_p10 }
  0x22   :  { %116 = shalt.err (!%p113_p0)
}
  0x23   :  { %55 = dma.vmem_to_hbm [thread:$0]  %s53_s20, 256, %s160_s2, [#allocation4]  }
  0x24   :  { %129 = dma.done.wait [#allocation4], 256  }
  0x25   :  { %130 = vsyncadd [#allocation4], 4294967040 }
  0x26   :  { %59 = vsyncpa [#allocation3], 1 }
  0x27   :  { %60 = vsyncpa [#allocation6], 1 }
  0x28   :  { %61 = vsyncpa [#allocation4], 1 }

</bundles_post_ra>
